<compile_context>
chip_gen: v7x
topology: tpu7x:2x2x1
jax: 0.10.0
libtpu: 0.0.40
codegen_flags: <defaults>
</compile_context>

<pallas_src>
import functools

import jax
import jax.numpy as jnp
from jax.experimental import pallas as pl
from jax.experimental.pallas import tpu as pltpu

_LANES = 128


def _kl_kernel(x_ref, y_ref, out_ref, *, inv_t):
    c, r, lanes = x_ref.shape

    # Unroll the tiny softmax axis (leading dim, size C): every op below is a
    # dense (r, 128) element-wise VPU/EUP op, no cross-lane work.
    xs = [x_ref[j].astype(jnp.float32) * inv_t for j in range(c)]
    ys = [y_ref[j].astype(jnp.float32) * inv_t for j in range(c)]

    # log_softmax(x) pieces (numerically stable shifted form).
    x_max = functools.reduce(jnp.maximum, xs)
    x_sh = [v - x_max for v in xs]
    x_sum = functools.reduce(jnp.add, [jnp.exp(v) for v in x_sh])
    log_x_sum = jnp.log(x_sum)

    # softmax(y) / log_softmax(y) pieces.
    y_max = functools.reduce(jnp.maximum, ys)
    y_sh = [v - y_max for v in ys]
    y_exp = [jnp.exp(v) for v in y_sh]
    y_sum = functools.reduce(jnp.add, y_exp)
    inv_y_sum = 1.0 / y_sum          # one divide per column, not per element
    log_y_sum = jnp.log(y_sum)

    # sum_c q_c * (log q_c - log p_c)
    #   = sum_c (y_exp_c * inv_y_sum) * ((y_sh_c - x_sh_c) + (log_x_sum - log_y_sum))
    delta = log_x_sum - log_y_sum
    acc = jnp.zeros((r, lanes), jnp.float32)
    for j in range(c):
        acc = acc + (y_exp[j] * inv_y_sum) * ((y_sh[j] - x_sh[j]) + delta)

    # Collapse (r, 128) -> (1, 8, 128): lane-dense per-tile partial; the final
    # scalar reduction happens in the wrapper.
    out_ref[...] = jnp.sum(acc.reshape(r // 8, 8, lanes), axis=0, keepdims=True)


def _round_up(x, n):
    return -(-x // n) * n


def kl_loss(inputs, targets, t=1.0, tile_rows=512):
    """KL loss matching PyTorch KLLoss.forward. inputs/targets: (N, C, H, W)."""
    assert inputs.shape == targets.shape
    n, c, h, w = inputs.shape
    m = (n * c * h * w) // c  # == N*H*W, rows after view(-1, C)

    # Literal `.view(-1, C)` grouping, transposed so the big axis is minor.
    x_t = inputs.reshape(m, c).T  # (C, M)
    y_t = targets.reshape(m, c).T

    # Column tile = tile_rows * 128 lanes; shrink for small problems.
    if m < tile_rows * _LANES:
        tile_rows = _round_up(max(1, -(-m // _LANES)), 8)
    cols_per_tile = tile_rows * _LANES
    m_pad = _round_up(m, cols_per_tile)
    if m_pad != m:
        # Zero-padded columns have x == y -> zero KL contribution.
        x_t = jnp.pad(x_t, ((0, 0), (0, m_pad - m)))
        y_t = jnp.pad(y_t, ((0, 0), (0, m_pad - m)))

    num_tiles = m_pad // cols_per_tile
    x3 = x_t.reshape(c, m_pad // _LANES, _LANES)
    y3 = y_t.reshape(c, m_pad // _LANES, _LANES)

    kernel = functools.partial(_kl_kernel, inv_t=1.0 / float(t))

    partials = pl.pallas_call(
        kernel,
        out_shape=jax.ShapeDtypeStruct((num_tiles, 8, _LANES), jnp.float32),
        grid_spec=pltpu.PrefetchScalarGridSpec(
            num_scalar_prefetch=0,
            grid=(num_tiles,),
            in_specs=[
                pl.BlockSpec((c, tile_rows, _LANES), lambda i: (0, i, 0)),
                pl.BlockSpec((c, tile_rows, _LANES), lambda i: (0, i, 0)),
            ],
            out_specs=pl.BlockSpec((1, 8, _LANES), lambda i: (i, 0, 0)),
        ),
        compiler_params=pltpu.CompilerParams(
            dimension_semantics=("parallel",),
            vmem_limit_bytes=32 * 1024 * 1024,
        ),
    )(x3, y3)

    # reduction='batchmean' divides by the true row count M (not padded),
    # then the module scales by t*t.
    loss = jnp.sum(partials) / jnp.float32(m) * jnp.float32(t) * jnp.float32(t)
    # TODO(synk): PyTorch's runtime asserts (isfinite, loss >= 0) are host-side
    # checks with no in-kernel equivalent; they are verified in the harness below.
    return loss


def _reference_kl_loss(inputs, targets, t=1.0):
    c = inputs.shape[1]
    x = inputs.reshape(-1, c).astype(jnp.float32) / t
    y = targets.reshape(-1, c).astype(jnp.float32) / t
    log_p = jax.nn.log_softmax(x, axis=1)
    q = jax.nn.softmax(y, axis=1)
    log_q = jax.nn.log_softmax(y, axis=1)
    kl = jnp.sum(jnp.where(q > 0, q * (log_q - log_p), 0.0)) / x.shape[0]
    return kl * t * t


if __name__ == "__main__":
    key = jax.random.PRNGKey(0)
    k1, k2 = jax.random.split(key)
    N, C, H, W = 2, 4, 16, 16
    inputs = jax.random.normal(k1, (N, C, H, W), dtype=jnp.float32)
    targets = jax.random.normal(k2, (N, C, H, W), dtype=jnp.float32)

    t = 1.0
    loss = kl_loss(inputs, targets, t=t)
    loss = jax.block_until_ready(loss)

    ref = _reference_kl_loss(inputs, targets, t=t)
    assert jnp.isfinite(loss), f"loss is not finite: {loss}"
    assert loss >= 0.0, f"KL loss is negative: {loss}"
    assert jnp.allclose(loss, ref, rtol=1e-5, atol=1e-6), (loss, ref)

    print("KERNEL_OK")
</pallas_src>

<mosaic_0001>
module attributes {stable_mosaic.version = 11 : i64} {
  func.func @_kl_kernel(%arg0: i32, %arg1: memref<4x8x128xf32, #tpu.memory_space<vmem>>, %arg2: memref<4x8x128xf32, #tpu.memory_space<vmem>>, %arg3: memref<1x8x128xf32, #tpu.memory_space<vmem>>) attributes {dimension_semantics = [#tpu.dimension_semantics<parallel>], iteration_bounds = array<i64: 1>, scalar_prefetch = 0 : i64, scratch_operands = 0 : i64, tpu.core_type = #tpu.core_type<tc>, window_params = [{transform_indices = @transform_0, window_bounds = array<i64: 4, 8, 128>}, {transform_indices = @transform_1, window_bounds = array<i64: 4, 8, 128>}, {transform_indices = @transform_2, window_bounds = array<i64: 1, 8, 128>}]} {
    %c0 = arith.constant 0 : index
    %c0_0 = arith.constant 0 : index
    %c0_1 = arith.constant 0 : index
    %0 = vector.load %arg1[%c0, %c0_0, %c0_1] : memref<4x8x128xf32, #tpu.memory_space<vmem>>, vector<1x8x128xf32>
    %1 = vector.shape_cast %0 : vector<1x8x128xf32> to vector<8x128xf32>
    %cst = arith.constant 1.000000e+00 : f32
    %2 = vector.broadcast %cst : f32 to vector<8x128xf32>
    %3 = arith.mulf %1, %2 : vector<8x128xf32>
    %c1 = arith.constant 1 : index
    %c0_2 = arith.constant 0 : index
    %c0_3 = arith.constant 0 : index
    %4 = vector.load %arg1[%c1, %c0_2, %c0_3] : memref<4x8x128xf32, #tpu.memory_space<vmem>>, vector<1x8x128xf32>
    %5 = vector.shape_cast %4 : vector<1x8x128xf32> to vector<8x128xf32>
    %cst_4 = arith.constant 1.000000e+00 : f32
    %6 = vector.broadcast %cst_4 : f32 to vector<8x128xf32>
    %7 = arith.mulf %5, %6 : vector<8x128xf32>
    %c2 = arith.constant 2 : index
    %c0_5 = arith.constant 0 : index
    %c0_6 = arith.constant 0 : index
    %8 = vector.load %arg1[%c2, %c0_5, %c0_6] : memref<4x8x128xf32, #tpu.memory_space<vmem>>, vector<1x8x128xf32>
    %9 = vector.shape_cast %8 : vector<1x8x128xf32> to vector<8x128xf32>
    %cst_7 = arith.constant 1.000000e+00 : f32
    %10 = vector.broadcast %cst_7 : f32 to vector<8x128xf32>
    %11 = arith.mulf %9, %10 : vector<8x128xf32>
    %c3 = arith.constant 3 : index
    %c0_8 = arith.constant 0 : index
    %c0_9 = arith.constant 0 : index
    %12 = vector.load %arg1[%c3, %c0_8, %c0_9] : memref<4x8x128xf32, #tpu.memory_space<vmem>>, vector<1x8x128xf32>
    %13 = vector.shape_cast %12 : vector<1x8x128xf32> to vector<8x128xf32>
    %cst_10 = arith.constant 1.000000e+00 : f32
    %14 = vector.broadcast %cst_10 : f32 to vector<8x128xf32>
    %15 = arith.mulf %13, %14 : vector<8x128xf32>
    %c0_11 = arith.constant 0 : index
    %c0_12 = arith.constant 0 : index
    %c0_13 = arith.constant 0 : index
    %16 = vector.load %arg2[%c0_11, %c0_12, %c0_13] : memref<4x8x128xf32, #tpu.memory_space<vmem>>, vector<1x8x128xf32>
    %17 = vector.shape_cast %16 : vector<1x8x128xf32> to vector<8x128xf32>
    %cst_14 = arith.constant 1.000000e+00 : f32
    %18 = vector.broadcast %cst_14 : f32 to vector<8x128xf32>
    %19 = arith.mulf %17, %18 : vector<8x128xf32>
    %c1_15 = arith.constant 1 : index
    %c0_16 = arith.constant 0 : index
    %c0_17 = arith.constant 0 : index
    %20 = vector.load %arg2[%c1_15, %c0_16, %c0_17] : memref<4x8x128xf32, #tpu.memory_space<vmem>>, vector<1x8x128xf32>
    %21 = vector.shape_cast %20 : vector<1x8x128xf32> to vector<8x128xf32>
    %cst_18 = arith.constant 1.000000e+00 : f32
    %22 = vector.broadcast %cst_18 : f32 to vector<8x128xf32>
    %23 = arith.mulf %21, %22 : vector<8x128xf32>
    %c2_19 = arith.constant 2 : index
    %c0_20 = arith.constant 0 : index
    %c0_21 = arith.constant 0 : index
    %24 = vector.load %arg2[%c2_19, %c0_20, %c0_21] : memref<4x8x128xf32, #tpu.memory_space<vmem>>, vector<1x8x128xf32>
    %25 = vector.shape_cast %24 : vector<1x8x128xf32> to vector<8x128xf32>
    %cst_22 = arith.constant 1.000000e+00 : f32
    %26 = vector.broadcast %cst_22 : f32 to vector<8x128xf32>
    %27 = arith.mulf %25, %26 : vector<8x128xf32>
    %c3_23 = arith.constant 3 : index
    %c0_24 = arith.constant 0 : index
    %c0_25 = arith.constant 0 : index
    %28 = vector.load %arg2[%c3_23, %c0_24, %c0_25] : memref<4x8x128xf32, #tpu.memory_space<vmem>>, vector<1x8x128xf32>
    %29 = vector.shape_cast %28 : vector<1x8x128xf32> to vector<8x128xf32>
    %cst_26 = arith.constant 1.000000e+00 : f32
    %30 = vector.broadcast %cst_26 : f32 to vector<8x128xf32>
    %31 = arith.mulf %29, %30 : vector<8x128xf32>
    %32 = arith.maximumf %3, %7 : vector<8x128xf32>
    %33 = arith.maximumf %32, %11 : vector<8x128xf32>
    %34 = arith.maximumf %33, %15 : vector<8x128xf32>
    %35 = arith.subf %3, %34 : vector<8x128xf32>
    %36 = arith.subf %7, %34 : vector<8x128xf32>
    %37 = arith.subf %11, %34 : vector<8x128xf32>
    %38 = arith.subf %15, %34 : vector<8x128xf32>
    %39 = math.exp %35 : vector<8x128xf32>
    %40 = math.exp %36 : vector<8x128xf32>
    %41 = math.exp %37 : vector<8x128xf32>
    %42 = math.exp %38 : vector<8x128xf32>
    %43 = arith.addf %39, %40 : vector<8x128xf32>
    %44 = arith.addf %43, %41 : vector<8x128xf32>
    %45 = arith.addf %44, %42 : vector<8x128xf32>
    %46 = math.log %45 : vector<8x128xf32>
    %47 = arith.maximumf %19, %23 : vector<8x128xf32>
    %48 = arith.maximumf %47, %27 : vector<8x128xf32>
    %49 = arith.maximumf %48, %31 : vector<8x128xf32>
    %50 = arith.subf %19, %49 : vector<8x128xf32>
    %51 = arith.subf %23, %49 : vector<8x128xf32>
    %52 = arith.subf %27, %49 : vector<8x128xf32>
    %53 = arith.subf %31, %49 : vector<8x128xf32>
    %54 = math.exp %50 : vector<8x128xf32>
    %55 = math.exp %51 : vector<8x128xf32>
    %56 = math.exp %52 : vector<8x128xf32>
    %57 = math.exp %53 : vector<8x128xf32>
    %58 = arith.addf %54, %55 : vector<8x128xf32>
    %59 = arith.addf %58, %56 : vector<8x128xf32>
    %60 = arith.addf %59, %57 : vector<8x128xf32>
    %cst_27 = arith.constant 1.000000e+00 : f32
    %61 = vector.broadcast %cst_27 : f32 to vector<8x128xf32>
    %62 = arith.divf %61, %60 : vector<8x128xf32>
    %63 = math.log %60 : vector<8x128xf32>
    %64 = arith.subf %46, %63 : vector<8x128xf32>
    %cst_28 = arith.constant 0.000000e+00 : f32
    %65 = vector.broadcast %cst_28 : f32 to vector<8x128xf32>
    %66 = arith.mulf %54, %62 : vector<8x128xf32>
    %67 = arith.subf %50, %35 : vector<8x128xf32>
    %68 = arith.addf %67, %64 : vector<8x128xf32>
    %69 = arith.mulf %66, %68 : vector<8x128xf32>
    %70 = arith.addf %65, %69 : vector<8x128xf32>
    %71 = arith.mulf %55, %62 : vector<8x128xf32>
    %72 = arith.subf %51, %36 : vector<8x128xf32>
    %73 = arith.addf %72, %64 : vector<8x128xf32>
    %74 = arith.mulf %71, %73 : vector<8x128xf32>
    %75 = arith.addf %70, %74 : vector<8x128xf32>
    %76 = arith.mulf %56, %62 : vector<8x128xf32>
    %77 = arith.subf %52, %37 : vector<8x128xf32>
    %78 = arith.addf %77, %64 : vector<8x128xf32>
    %79 = arith.mulf %76, %78 : vector<8x128xf32>
    %80 = arith.addf %75, %79 : vector<8x128xf32>
    %81 = arith.mulf %57, %62 : vector<8x128xf32>
    %82 = arith.subf %53, %38 : vector<8x128xf32>
    %83 = arith.addf %82, %64 : vector<8x128xf32>
    %84 = arith.mulf %81, %83 : vector<8x128xf32>
    %85 = arith.addf %80, %84 : vector<8x128xf32>
    %86 = vector.shape_cast %85 : vector<8x128xf32> to vector<1x8x128xf32>
    %cst_29 = arith.constant dense<0.000000e+00> : vector<8x128xf32>
    %87 = vector.multi_reduction <add>, %86, %cst_29 [0] : vector<1x8x128xf32> to vector<8x128xf32>
    %88 = vector.shape_cast %87 : vector<8x128xf32> to vector<1x8x128xf32>
    %c0_30 = arith.constant 0 : index
    %c0_31 = arith.constant 0 : index
    %c0_32 = arith.constant 0 : index
    %89 = vector.load %arg3[%c0_30, %c0_31, %c0_32] : memref<1x8x128xf32, #tpu.memory_space<vmem>>, vector<1x8x128xf32>
    tpu.vector_store %arg3[%c0_30, %c0_31, %c0_32], %88 {strides = array<i32>} : memref<1x8x128xf32, #tpu.memory_space<vmem>>, vector<1x8x128xf32>,
    return
  }
  func.func @transform_0(%arg0: i32) -> (i32, i32, i32) {
    %c0_i32 = arith.constant 0 : i32
    %c0_i32_0 = arith.constant 0 : i32
    %c0_i32_1 = arith.constant 0 : i32
    return %c0_i32, %arg0, %c0_i32_0 : i32, i32, i32
  }
  func.func @transform_1(%arg0: i32) -> (i32, i32, i32) {
    %c0_i32 = arith.constant 0 : i32
    %c0_i32_0 = arith.constant 0 : i32
    %c0_i32_1 = arith.constant 0 : i32
    return %c0_i32, %arg0, %c0_i32_0 : i32, i32, i32
  }
  func.func @transform_2(%arg0: i32) -> (i32, i32, i32) {
    %c0_i32 = arith.constant 0 : i32
    %c0_i32_0 = arith.constant 0 : i32
    %c0_i32_1 = arith.constant 0 : i32
    return %arg0, %c0_i32, %c0_i32_0 : i32, i32, i32
  }
}

</mosaic_0001>

<bundles_post_ra>
// kernel: tpu_custom_call.1
= control target key start
LH: loop header
LB: loop body
LE: loop exit
PB: predicated region body
PF: predicated region fallthrough
CT: control target
= control target key end

     0   :  { %7 = vsyncpa [#allocation3], 0  ;;  %s290_s0 = inlined_call_operand.hbm [shape: f32[4,8,128], index: 0, kind: input, shape index: {}]   ;;  %s291_s1 = inlined_call_operand.hbm [shape: f32[4,8,128], index: 1, kind: input, shape index: {}]   ;;  %s292_s2 = inlined_call_operand.hbm [shape: f32[1,8,128], index: 2, kind: output, shape index: {}]  }
   0x1   :  { %8 = vsyncpa [#allocation6], 0 }
   0x2   :  { %9 = vsyncpa [#allocation4], 0  ;;  %s234_s9 = smov [#allocation2]   ;;  %s162_s13 = scalar_lea.hbm %s290_s0, 512 }
   0x3   :  { %s15_s10 = sshll.u32 %s234_s9, 4  ;;  %p163_p0 = scmp.ne.s32.totalorder %s290_s0, %s162_s13  ;;  %s16_s10 = int_to_ptr.vmem [resolvable:$true] %s15_s10 }
   0x4   :  { %p166_p1 = scmp.lt.u32.totalorder %s162_s13, %s290_s0 }
   0x6   :  { %p168_p2 = pnand %p166_p1, %p163_p0 }
   0x8   :  { %171 = shalt.err (!%p168_p2)
}
   0x9   :  { %s172_s18 = scalar_lea.vmem %s16_s10, 512  ;;  %p177_p4 = scmp.lt.s32.totalorder %s16_s10, %s16_s10 }
   0xa   :  { %p173_p3 = scmp.ne.s32.totalorder %s16_s10, %s172_s18  ;;  %p178_p5 = scmp.lt.s32.totalorder %s172_s18, %s172_s18 }
   0xc   :  { %p179_p6 = por %p178_p5, %p177_p4 }
   0xe   :  { %p180_p7 = pnand %p179_p6, %p173_p3 }
  0x10   :  { %183 = shalt.err (!%p180_p7)
}
  0x11   :  { %s235_s19 = smov 128   ;;  %s236_s20 = smov 8  }
  0x12   :  { %21 = dma.hbm_to_vmem [thread:$0]  %s290_s0, 512, %s16_s10, [#allocation3], %s235_s19, %s235_s19, %s236_s20  }
  0x13   :  { %s237_s23 = smov [#allocation5]   ;;  %s184_s27 = scalar_lea.hbm %s291_s1, 512 }
  0x14   :  { %s27_s24 = sshll.u32 %s237_s23, 4  ;;  %p185_p8 = scmp.ne.s32.totalorder %s291_s1, %s184_s27  ;;  %s28_s24 = int_to_ptr.vmem [resolvable:$true] %s27_s24 }
  0x15   :  { %p188_p9 = scmp.lt.u32.totalorder %s184_s27, %s291_s1 }
  0x17   :  { %p190_p10 = pnand %p188_p9, %p185_p8 }
  0x19   :  { %193 = shalt.err (!%p190_p10)
}
  0x1a   :  { %s194_s4 = scalar_lea.vmem %s28_s24, 512  ;;  %p199_p12 = scmp.lt.s32.totalorder %s28_s24, %s28_s24 }
  0x1b   :  { %p195_p11 = scmp.ne.s32.totalorder %s28_s24, %s194_s4  ;;  %p200_p13 = scmp.lt.s32.totalorder %s194_s4, %s194_s4 }
  0x1d   :  { %p201_p0 = por %p200_p13, %p199_p12 }
  0x1f   :  { %p202_p1 = pnand %p201_p0, %p195_p11 }
  0x21   :  { %205 = shalt.err (!%p202_p1)
}
  0x22   :  { %33 = dma.hbm_to_vmem [thread:$0]  %s291_s1, 512, %s28_s24, [#allocation6], %s235_s19, %s235_s19, %s236_s20  }
  0x23   :  { %228 = dma.done.wait [#allocation3], 512  }
  0x24   :  { %229 = vsyncadd [#allocation3], 4294966784 }
  0x25   :  { %230 = dma.done.wait [#allocation6], 512  }
  0x26   :  { %231 = vsyncadd [#allocation6], 4294966784  ;;  %v40_v0 = vld [vmem:[#allocation2] sm:$0xff]  ;;  %v42_v1 = vld [vmem:[#allocation2 + $0x8] sm:$0xff]  ;;  %s238_s1 = smov [#allocation7]  }
  0x27   :  { %v44_v2 = vld [vmem:[#allocation2 + $0x10] sm:$0xff]  ;;  %v47_v3 = vld [vmem:[#allocation5] sm:$0xff]  ;;  %v49_v4 = vld [vmem:[#allocation5 + $0x8] sm:$0xff]  ;;  %v54_v5 = vmax.f32 %v40_v0, %v42_v1  ;;  %s125_s6 = sshll.u32 %s238_s1, 4  ;;  %s126_s6 = int_to_ptr.vmem [resolvable:$true] %s125_s6 }
  0x28   :  { %v46_v6 = vld [vmem:[#allocation2 + $0x18] sm:$0xff]  ;;  %v51_v7 = vld [vmem:[#allocation5 + $0x10] sm:$0xff]  ;;  %v74_v8 = vmax.f32 %v47_v3, %v49_v4  ;;  %s206_s7 = scalar_lea.vmem %s126_s6, 128  ;;  %p211_p3 = scmp.lt.s32.totalorder %s126_s6, %s126_s6 }
  0x29   :  { %v53_v9 = vld [vmem:[#allocation5 + $0x18] sm:$0xff]  ;;  %v55_v10 = vmax.f32 %v54_v5, %v44_v2  ;;  %p207_p2 = scmp.ne.s32.totalorder %s126_s6, %s206_s7  ;;  %p212_p4 = scmp.lt.s32.totalorder %s206_s7, %s206_s7 }
  0x2a   :  { %v75_v11 = vmax.f32 %v74_v8, %v51_v7 }
  0x2b   :  { %v56_v12 = vmax.f32 %v55_v10, %v46_v6  ;;  %p213_p5 = por %p212_p4, %p211_p3 }
  0x2c   :  { %v76_v13 = vmax.f32 %v75_v11, %v53_v9 }
  0x2d   :  { %v57_v14 = vsub.f32 %v40_v0, %v56_v12  ;;  %v58_v15 = vsub.f32 %v42_v1, %v56_v12  ;;  %v59_v16 = vsub.f32 %v44_v2, %v56_v12  ;;  %v60_v17 = vsub.f32 %v46_v6, %v56_v12  ;;  %p214_p6 = pnand %p213_p5, %p207_p2 }
  0x2e   :  { %v77_v18 = vsub.f32 %v47_v3, %v76_v13  ;;  %v78_v19 = vsub.f32 %v49_v4, %v76_v13  ;;  %v79_v23 = vsub.f32 %v51_v7, %v76_v13  ;;  %v80_v25 = vsub.f32 %v53_v9, %v76_v13 }
  0x2f   :  { %v61_v20 = vmul.f32 1.442695, %v57_v14  ;;  %v63_v21 = vmul.f32 1.442695, %v58_v15  ;;  %v65_v22 = vmul.f32 1.442695, %v59_v16 }
  0x30   :  { %v67_v24 = vmul.f32 1.442695, %v60_v17  ;;  %v81_v26 = vmul.f32 1.442695, %v77_v18  ;;  %v83_v27 = vmul.f32 1.442695, %v78_v19  ;;  %v98_v48 = vsub.f32 %v77_v18, %v57_v14 }
  0x31   :  { %140 = vpow2.f32 %v61_v20  ;;  %v85_v28 = vmul.f32 1.442695, %v79_v23  ;;  %v87_v29 = vmul.f32 1.442695, %v80_v25  ;;  %v103_v50 = vsub.f32 %v78_v19, %v58_v15 }
  0x32   :  { %142 = vpow2.f32 %v63_v21  ;;  %v108_v51 = vsub.f32 %v79_v23, %v59_v16  ;;  %v113_v52 = vsub.f32 %v80_v25, %v60_v17 }
  0x33   :  { %144 = vpow2.f32 %v65_v22 }
  0x34   :  { %146 = vpow2.f32 %v67_v24 }
  0x35   :  { %148 = vpow2.f32 %v81_v26 }
  0x36   :  { %150 = vpow2.f32 %v83_v27 }
  0x37   :  { %152 = vpow2.f32 %v85_v28 }
  0x38   :  { %154 = vpow2.f32 %v87_v29 }
  0x3b   :  { %v141_v30 = vpop.eup %140 }
  0x3c   :  { %v143_v31 = vpop.eup %142 }
  0x3d   :  { %v145_v32 = vpop.eup %144  ;;  %v69_v33 = vadd.f32 %v143_v31, %v141_v30 }
  0x3e   :  { %v147_v34 = vpop.eup %146 }
  0x3f   :  { %v149_v35 = vpop.eup %148  ;;  %v70_v36 = vadd.f32 %v145_v32, %v69_v33 }
  0x40   :  { %v151_v37 = vpop.eup %150 }
  0x41   :  { %v153_v38 = vpop.eup %152  ;;  %v71_v39 = vadd.f32 %v147_v34, %v70_v36  ;;  %v89_v40 = vadd.f32 %v151_v37, %v149_v35 }
  0x42   :  { %v155_v41 = vpop.eup %154 }
  0x43   :  { %v90_v42 = vadd.f32 %v153_v38, %v89_v40  ;;  %156 = vlog2.f32 %v71_v39 }
  0x45   :  { %v91_v43 = vadd.f32 %v155_v41, %v90_v42 }
  0x47   :  { %158 = vrcp.f32 %v91_v43 }
  0x48   :  { %160 = vlog2.f32 %v91_v43 }
  0x4d   :  { %v157_v44 = vpop.eup %156 }
  0x4e   :  { %v73_v46 = vmul.f32 0.6931472, %v157_v44 }
  0x51   :  { %v159_v45 = vpop.eup %158 }
  0x52   :  { %v161_v47 = vpop.eup %160  ;;  %v97_v54 = vmul.f32 %v159_v45, %v149_v35  ;;  %v102_v55 = vmul.f32 %v159_v45, %v151_v37  ;;  %v107_v56 = vmul.f32 %v159_v45, %v153_v38  ;;  %v112_v57 = vmul.f32 %v159_v45, %v155_v41 }
  0x53   :  { %v95_v49 = vmul.f32 0.6931472, %v161_v47 }
  0x55   :  { %v96_v53 = vsub.f32 %v73_v46, %v95_v49 }
  0x57   :  { %v99_v58 = vadd.f32 %v98_v48, %v96_v53  ;;  %v104_v59 = vadd.f32 %v103_v50, %v96_v53  ;;  %v109_v60 = vadd.f32 %v108_v51, %v96_v53  ;;  %v114_v61 = vadd.f32 %v113_v52, %v96_v53 }
  0x59   :  { %v100_v62 = vmul.f32 %v99_v58, %v97_v54  ;;  %v105_v63 = vmul.f32 %v104_v59, %v102_v55  ;;  %v110_v0 = vmul.f32 %v109_v60, %v107_v56  ;;  %v115_v2 = vmul.f32 %v114_v61, %v112_v57 }
  0x5b   :  { %v106_v1 = vadd.f32 %v105_v63, %v100_v62 }
  0x5d   :  { %v111_v3 = vadd.f32 %v110_v0, %v106_v1 }
  0x5f   :  { %v116_v4 = vadd.f32 %v115_v2, %v111_v3 }
  0x61   :  { %118 = vst [vmem:[#allocation7] sm:$0xff] %v116_v4 }
  0x62   :  { %217 = shalt.err (!%p214_p6)
}
  0x63   :  { %s218_s10 = scalar_lea.hbm %s292_s2, 128 }
  0x64   :  { %p219_p7 = scmp.ne.s32.totalorder %s292_s2, %s218_s10  ;;  %p222_p8 = scmp.lt.u32.totalorder %s218_s10, %s292_s2 }
  0x66   :  { %p224_p9 = pnand %p222_p8, %p219_p7 }
  0x68   :  { %227 = shalt.err (!%p224_p9)
}
  0x69   :  { %128 = dma.vmem_to_hbm [thread:$0]  %s126_s6, 128, %s292_s2, [#allocation4]  }
  0x6a   :  { %232 = dma.done.wait [#allocation4], 128  }
  0x6b   :  { %233 = vsyncadd [#allocation4], 4294967168 }
  0x6c   :  { %132 = vsyncpa [#allocation3], 1 }
  0x6d   :  { %133 = vsyncpa [#allocation6], 1 }
  0x6e   :  { %134 = vsyncpa [#allocation4], 1 }

</bundles_post_ra>
